<compile_context>
chip_gen: v5e
topology: v5e:2x2
jax: 0.10.0
libtpu: 0.0.40
codegen_flags: <defaults>
</compile_context>

<pallas_src>
import jax
import jax.numpy as jnp
from jax.experimental import pallas as pl
from jax.experimental.pallas import tpu as pltpu

KH = KW = 3                      # Conv2d(1, 1, 3)
LANE_MIN = 128                   # minimum lane block (one lane tile)
LANE_MAX = 1024                  # widest lane block we ever use
VMEM_BLOCK_BUDGET = 8 * 1024 * 1024   # per-step (in + out) block budget, bytes


def _round_up(a, b):
    return ((a + b - 1) // b) * b


def conv_tanh_kernel(x_ref, w_ref, b_ref, o_ref):
    """x_ref: VMEM (H, W_pad, LANES)  -- images with batch on the lane axis.
    w_ref: SMEM (9,) flattened 3x3 weights;  b_ref: SMEM (1,) bias.
    o_ref: VMEM (OH, OW_pad, LANES)."""
    oh, ow, _ = o_ref.shape
    # 3x3 correlation as 9 shifted MACs.  Each tap is read directly from the
    # ref (no full-tile materialization -> no vreg spills); shifts are over
    # the leading H dim and the sublane W dim only, never over lanes.
    acc = w_ref[0] * x_ref[pl.ds(0, oh), pl.ds(0, ow), :] + b_ref[0]
    for ky in range(KH):
        for kx in range(KW):
            if ky == 0 and kx == 0:
                continue
            tap = x_ref[pl.ds(ky, oh), pl.ds(kx, ow), :]
            acc = acc + w_ref[ky * KW + kx] * tap
    o_ref[...] = jnp.tanh(acc)


def conv2d_tanh(x_nchw, weight, bias):
    """x_nchw: (N, 1, H, W) float32
    weight:  (1, 1, 3, 3) float32   (PyTorch OIHW)
    bias:    (1,) float32
    returns  (N, 1, H-2, W-2) float32
    """
    n, c, h, w = x_nchw.shape
    assert c == 1, "ModelTanh uses a single input channel"
    oh, ow = h - KH + 1, w - KW + 1

    # Pad output width to a multiple of 8 (unmasked stores); pad input width
    # by KW-1 beyond that so every kx tap of width ow_store stays in bounds.
    ow_store = _round_up(ow, 8)
    w_in = ow_store + KW - 1

    # Adaptive lane block: as wide as the batch allows (up to 1024 lanes),
    # capped by a per-step VMEM block budget; grid splits the rest.
    n128 = _round_up(n, LANE_MIN)
    bytes_per_lane = (h * w_in + oh * ow_store) * 4
    lane_cap = max(LANE_MIN,
                   (VMEM_BLOCK_BUDGET // bytes_per_lane) // LANE_MIN * LANE_MIN)
    lane_block = min(LANE_MAX, n128, lane_cap)
    n_pad = _round_up(n, lane_block)

    # Batch-in-lanes relayout: (N,H,W) -> (H, W_in, N_pad) in one pad+transpose
    # pass.  TODO(synk): if the surrounding model stays in this layout across
    # layers, drop this and the final transpose entirely.
    x = jnp.transpose(x_nchw.reshape(n, h, w).astype(jnp.float32), (1, 2, 0))
    x = jnp.pad(x, ((0, 0), (0, w_in - w), (0, n_pad - n)))

    w_flat = weight.reshape(KH * KW).astype(jnp.float32)
    b = bias.reshape(1).astype(jnp.float32)

    out = pl.pallas_call(
        conv_tanh_kernel,
        out_shape=jax.ShapeDtypeStruct((oh, ow_store, n_pad), jnp.float32),
        grid=(n_pad // lane_block,),
        in_specs=[
            pl.BlockSpec((h, w_in, lane_block), lambda i: (0, 0, i)),   # images
            pl.BlockSpec(memory_space=pltpu.MemorySpace.SMEM),          # weights
            pl.BlockSpec(memory_space=pltpu.MemorySpace.SMEM),          # bias
        ],
        out_specs=pl.BlockSpec((oh, ow_store, lane_block), lambda i: (0, 0, i)),
        compiler_params=pltpu.CompilerParams(
            dimension_semantics=("parallel",)),      # lane-blocks split across TCs
    )(x, w_flat, b)

    out = out[:, :ow, :n]                            # drop W / lane padding
    return jnp.transpose(out, (2, 0, 1)).reshape(n, 1, oh, ow)


if __name__ == "__main__":
    key = jax.random.PRNGKey(0)
    kx, kw, kb = jax.random.split(key, 3)

    # Small shapes consistent with the module: N=2, C=1, H=W=16.
    x = jax.random.normal(kx, (2, 1, 16, 16), dtype=jnp.float32)

    # Deterministic parameter init (uniform like PyTorch's default range).
    fan_in = 1 * KH * KW
    bound = 1.0 / (fan_in ** 0.5)
    weight = jax.random.uniform(kw, (1, 1, KH, KW), jnp.float32, -bound, bound)
    bias = jax.random.uniform(kb, (1,), jnp.float32, -bound, bound)

    y = conv2d_tanh(x, weight, bias)
    jax.block_until_ready(y)

    # Reference check against plain-JAX conv + tanh.
    ref = jax.lax.conv_general_dilated(
        x, weight, window_strides=(1, 1), padding="VALID",
        dimension_numbers=("NCHW", "OIHW", "NCHW"))
    ref = jnp.tanh(ref + bias.reshape(1, 1, 1, 1))
    assert y.shape == (2, 1, 14, 14), y.shape
    assert jnp.allclose(y, ref, atol=1e-5), float(jnp.max(jnp.abs(y - ref)))

    print("KERNEL_OK")
</pallas_src>

<mosaic_0001>
module attributes {stable_mosaic.version = 11 : i64} {
  func.func @conv_tanh_kernel(%arg0: i32, %arg1: memref<16x18x128xf32, #tpu.memory_space<vmem>>, %arg2: memref<9xf32, #tpu.memory_space<smem>>, %arg3: memref<1xf32, #tpu.memory_space<smem>>, %arg4: memref<14x16x128xf32, #tpu.memory_space<vmem>>) attributes {dimension_semantics = [#tpu.dimension_semantics<parallel>], iteration_bounds = array<i64: 1>, scalar_prefetch = 0 : i64, scratch_operands = 0 : i64, tpu.core_type = #tpu.core_type<tc>, window_params = [{transform_indices = @transform_0, window_bounds = array<i64: 16, 18, 128>}, {transform_indices = @transform_1, window_bounds = array<i64: 9>}, {transform_indices = @transform_2, window_bounds = array<i64: 1>}, {transform_indices = @transform_3, window_bounds = array<i64: 14, 16, 128>}]} {
    %c0 = arith.constant 0 : index
    %0 = memref.load %arg2[%c0] : memref<9xf32, #tpu.memory_space<smem>>
    %c0_0 = arith.constant 0 : index
    %c0_1 = arith.constant 0 : index
    %c0_2 = arith.constant 0 : index
    %1 = vector.load %arg1[%c0_0, %c0_1, %c0_2] : memref<16x18x128xf32, #tpu.memory_space<vmem>>, vector<14x16x128xf32>
    %2 = vector.broadcast %0 : f32 to vector<14x16x128xf32>
    %3 = arith.mulf %2, %1 : vector<14x16x128xf32>
    %c0_3 = arith.constant 0 : index
    %4 = memref.load %arg3[%c0_3] : memref<1xf32, #tpu.memory_space<smem>>
    %5 = vector.broadcast %4 : f32 to vector<14x16x128xf32>
    %6 = arith.addf %3, %5 : vector<14x16x128xf32>
    %c0_4 = arith.constant 0 : index
    %c1 = arith.constant 1 : index
    %c0_5 = arith.constant 0 : index
    %7 = vector.load %arg1[%c0_4, %c1, %c0_5] : memref<16x18x128xf32, #tpu.memory_space<vmem>>, vector<14x16x128xf32>
    %c1_6 = arith.constant 1 : index
    %8 = memref.load %arg2[%c1_6] : memref<9xf32, #tpu.memory_space<smem>>
    %9 = vector.broadcast %8 : f32 to vector<14x16x128xf32>
    %10 = arith.mulf %9, %7 : vector<14x16x128xf32>
    %11 = arith.addf %6, %10 : vector<14x16x128xf32>
    %c0_7 = arith.constant 0 : index
    %c2 = arith.constant 2 : index
    %c0_8 = arith.constant 0 : index
    %12 = vector.load %arg1[%c0_7, %c2, %c0_8] : memref<16x18x128xf32, #tpu.memory_space<vmem>>, vector<14x16x128xf32>
    %c2_9 = arith.constant 2 : index
    %13 = memref.load %arg2[%c2_9] : memref<9xf32, #tpu.memory_space<smem>>
    %14 = vector.broadcast %13 : f32 to vector<14x16x128xf32>
    %15 = arith.mulf %14, %12 : vector<14x16x128xf32>
    %16 = arith.addf %11, %15 : vector<14x16x128xf32>
    %c1_10 = arith.constant 1 : index
    %c0_11 = arith.constant 0 : index
    %c0_12 = arith.constant 0 : index
    %17 = vector.load %arg1[%c1_10, %c0_11, %c0_12] : memref<16x18x128xf32, #tpu.memory_space<vmem>>, vector<14x16x128xf32>
    %c3 = arith.constant 3 : index
    %18 = memref.load %arg2[%c3] : memref<9xf32, #tpu.memory_space<smem>>
    %19 = vector.broadcast %18 : f32 to vector<14x16x128xf32>
    %20 = arith.mulf %19, %17 : vector<14x16x128xf32>
    %21 = arith.addf %16, %20 : vector<14x16x128xf32>
    %c1_13 = arith.constant 1 : index
    %c1_14 = arith.constant 1 : index
    %c0_15 = arith.constant 0 : index
    %22 = vector.load %arg1[%c1_13, %c1_14, %c0_15] : memref<16x18x128xf32, #tpu.memory_space<vmem>>, vector<14x16x128xf32>
    %c4 = arith.constant 4 : index
    %23 = memref.load %arg2[%c4] : memref<9xf32, #tpu.memory_space<smem>>
    %24 = vector.broadcast %23 : f32 to vector<14x16x128xf32>
    %25 = arith.mulf %24, %22 : vector<14x16x128xf32>
    %26 = arith.addf %21, %25 : vector<14x16x128xf32>
    %c1_16 = arith.constant 1 : index
    %c2_17 = arith.constant 2 : index
    %c0_18 = arith.constant 0 : index
    %27 = vector.load %arg1[%c1_16, %c2_17, %c0_18] : memref<16x18x128xf32, #tpu.memory_space<vmem>>, vector<14x16x128xf32>
    %c5 = arith.constant 5 : index
    %28 = memref.load %arg2[%c5] : memref<9xf32, #tpu.memory_space<smem>>
    %29 = vector.broadcast %28 : f32 to vector<14x16x128xf32>
    %30 = arith.mulf %29, %27 : vector<14x16x128xf32>
    %31 = arith.addf %26, %30 : vector<14x16x128xf32>
    %c2_19 = arith.constant 2 : index
    %c0_20 = arith.constant 0 : index
    %c0_21 = arith.constant 0 : index
    %32 = vector.load %arg1[%c2_19, %c0_20, %c0_21] : memref<16x18x128xf32, #tpu.memory_space<vmem>>, vector<14x16x128xf32>
    %c6 = arith.constant 6 : index
    %33 = memref.load %arg2[%c6] : memref<9xf32, #tpu.memory_space<smem>>
    %34 = vector.broadcast %33 : f32 to vector<14x16x128xf32>
    %35 = arith.mulf %34, %32 : vector<14x16x128xf32>
    %36 = arith.addf %31, %35 : vector<14x16x128xf32>
    %c2_22 = arith.constant 2 : index
    %c1_23 = arith.constant 1 : index
    %c0_24 = arith.constant 0 : index
    %37 = vector.load %arg1[%c2_22, %c1_23, %c0_24] : memref<16x18x128xf32, #tpu.memory_space<vmem>>, vector<14x16x128xf32>
    %c7 = arith.constant 7 : index
    %38 = memref.load %arg2[%c7] : memref<9xf32, #tpu.memory_space<smem>>
    %39 = vector.broadcast %38 : f32 to vector<14x16x128xf32>
    %40 = arith.mulf %39, %37 : vector<14x16x128xf32>
    %41 = arith.addf %36, %40 : vector<14x16x128xf32>
    %c2_25 = arith.constant 2 : index
    %c2_26 = arith.constant 2 : index
    %c0_27 = arith.constant 0 : index
    %42 = vector.load %arg1[%c2_25, %c2_26, %c0_27] : memref<16x18x128xf32, #tpu.memory_space<vmem>>, vector<14x16x128xf32>
    %c8 = arith.constant 8 : index
    %43 = memref.load %arg2[%c8] : memref<9xf32, #tpu.memory_space<smem>>
    %44 = vector.broadcast %43 : f32 to vector<14x16x128xf32>
    %45 = arith.mulf %44, %42 : vector<14x16x128xf32>
    %46 = arith.addf %41, %45 : vector<14x16x128xf32>
    %47 = math.tanh %46 : vector<14x16x128xf32>
    %c0_28 = arith.constant 0 : index
    %c0_29 = arith.constant 0 : index
    %c0_30 = arith.constant 0 : index
    %48 = vector.load %arg4[%c0_28, %c0_29, %c0_30] : memref<14x16x128xf32, #tpu.memory_space<vmem>>, vector<14x16x128xf32>
    tpu.vector_store %arg4[%c0_28, %c0_29, %c0_30], %47 {strides = array<i32>} : memref<14x16x128xf32, #tpu.memory_space<vmem>>, vector<14x16x128xf32>,
    return
  }
  func.func @transform_0(%arg0: i32) -> (i32, i32, i32) {
    %c0_i32 = arith.constant 0 : i32
    %c0_i32_0 = arith.constant 0 : i32
    %c0_i32_1 = arith.constant 0 : i32
    return %c0_i32, %c0_i32_0, %arg0 : i32, i32, i32
  }
  func.func @transform_1(%arg0: i32) -> i32 {
    %c0_i32 = arith.constant 0 : i32
    %c0_i32_0 = arith.constant 0 : i32
    return %c0_i32 : i32
  }
  func.func @transform_2(%arg0: i32) -> i32 {
    %c0_i32 = arith.constant 0 : i32
    %c0_i32_0 = arith.constant 0 : i32
    return %c0_i32 : i32
  }
  func.func @transform_3(%arg0: i32) -> (i32, i32, i32) {
    %c0_i32 = arith.constant 0 : i32
    %c0_i32_0 = arith.constant 0 : i32
    %c0_i32_1 = arith.constant 0 : i32
    return %c0_i32, %c0_i32_0, %arg0 : i32, i32, i32
  }
}

</mosaic_0001>

<bundles_post_ra>
// kernel: tpu_custom_call.1
= control target key start
LH: loop header
LB: loop body
LE: loop exit
PB: predicated region body
PF: predicated region fallthrough
CT: control target
= control target key end

     0   :  { %9 = vsyncpa [#allocation5], 0  ;;  %s1782_s0 = inlined_call_operand.vmem [shape: f32[16,18,128], index: 0, kind: input, shape index: {}]   ;;  %s1783_s1 = inlined_call_operand.vmem [shape: f32[9], index: 1, kind: input, shape index: {}]   ;;  %s1784_s2 = inlined_call_operand.<no memory space> [shape: f32[1], index: 2, kind: input, shape index: {}]   ;;  %s1785_s3 = inlined_call_operand.hbm [shape: f32[14,16,128], index: 3, kind: output, shape index: {}]  }
   0x1   :  { %10 = vsyncpa [#allocation4], 0  ;;  %s18_s14 = sshll.u32 %s1783_s1, 4  ;;  %s1158_s15 = smov [#allocation3]   ;;  %s19_s14 = int_to_ptr.vmem [resolvable:$true] %s18_s14 }
   0x2   :  { %21 = dma.vmem_to_smem %s19_s14, 16, %s1158_s15, [#allocation5]  }
   0x3   :  { %1154 = dma.done.wait [#allocation5], 16  }
   0x4   :  { %1155 = vsyncadd [#allocation5], 4294967280 }
   0x5   :  { %28 = sfence }
   0x6   :  { %s29_s16 = sld [smem:[#allocation3]]  ;;  %v30_v0 = vld [vmem:[%s1782_s0] sm:$0xff]  ;;  %v31_v1 = vld [vmem:[%s1782_s0 + $0x8] sm:$0xff]  ;;  %v1202_v5 = vstv %s1784_s2  ;;  %v884_v16 = vld [vmem:[%s1782_s0 + $0x18] sm:$0xff]  ;;  %s1160_s20 = smov 128  }
   0x7   :  { %s882_s17 = sld [smem:[#allocation3 + $0x1]]  ;;  %v117_v2 = vld [vmem:[%s1782_s0 + $0x1] sm:$0xff]  ;;  %v118_v3 = vld [vmem:[%s1782_s0 + $0x9] sm:$0xff]  ;;  %v913_v24 = vld [vmem:[%s1782_s0 + $0x19] sm:$0xff]  ;;  %s1161_s21 = smov 8  }
   0x8   :  { %s883_s18 = sld [smem:[#allocation3 + $0x2]]  ;;  %v203_v6 = vld [vmem:[%s1782_s0 + $0x2] sm:$0xff]  ;;  %v204_v10 = vld [vmem:[%s1782_s0 + $0xa] sm:$0xff]  ;;  %v942_v32 = vld [vmem:[%s1782_s0 + $0x1a] sm:$0xff] }
   0x9   :  { %s912_s19 = sld [smem:[#allocation3 + $0x3]]  ;;  %v885_v21 = vld [vmem:[%s1782_s0 + $0x20] sm:$0xff]  ;;  %v971_v41 = vld [vmem:[%s1782_s0 + $0x30] sm:$0xff]  ;;  %v972_v47 = vld [vmem:[%s1782_s0 + $0x38] sm:$0xff] }
   0xa   :  { %s941_s22 = sld [smem:[#allocation3 + $0x4]]  ;;  %v914_v29 = vld [vmem:[%s1782_s0 + $0x21] sm:$0xff]  ;;  %v1000_v45 = vld [vmem:[%s1782_s0 + $0x31] sm:$0xff]  ;;  %v1001_v54 = vld [vmem:[%s1782_s0 + $0x39] sm:$0xff] }
   0xb   :  { %s970_s26 = sld [smem:[#allocation3 + $0x5]]  ;;  %v943_v37 = vld [vmem:[%s1782_s0 + $0x22] sm:$0xff]  ;;  %v1029_v55 = vld [vmem:[%s1782_s0 + $0x32] sm:$0xff] }
   0xc   :  { %v1197_v4 = vstv %s29_s16  ;;  %s999_s6 = sld [smem:[#allocation3 + $0x6]]  ;;  %s1159_s16 = smov [#allocation6]  }
   0xd   :  { %v59_v7 = vmul.f32 %v1197_v4, %v30_v0  ;;  %v1208_v8 = vstv %s882_s17  ;;  %s1028_s7 = sld [smem:[#allocation3 + $0x7]]  ;;  %v60_v9 = vmul.f32 %v1197_v4, %v31_v1  ;;  %v61_v30 = vmul.f32 %v884_v16, %v1197_v4  ;;  %v1030_v0 = vld [vmem:[%s1782_s0 + $0x3a] sm:$0xff]  ;;  %s867_s17 = sshll.u32 %s1159_s16, 4  ;;  %s868_s17 = int_to_ptr.vmem [resolvable:$true] %s867_s17 }
   0xe   :  { %v147_v11 = vmul.f32 %v1208_v8, %v117_v2  ;;  %v1215_v12 = vstv %s883_s18  ;;  %s1217_s2 = sld [smem:[#allocation3 + $0x8]]  ;;  %v148_v13 = vmul.f32 %v1208_v8, %v118_v3  ;;  %v149_v38 = vmul.f32 %v913_v24, %v1208_v8 }
   0xf   :  { %v89_v14 = vadd.f32 %v1202_v5, %v59_v7  ;;  %v233_v15 = vmul.f32 %v1215_v12, %v203_v6  ;;  %v1225_v17 = vstv %s912_s19  ;;  %v90_v18 = vadd.f32 %v1202_v5, %v60_v9  ;;  %s869_s19 = sshll.u32 %s1785_s3, 4  ;;  %s870_s19 = int_to_ptr.hbm [resolvable:$true] %s869_s19 }
  0x10   :  { %v1228_v19 = vstv %s941_s22  ;;  %v234_v20 = vmul.f32 %v1215_v12, %v204_v10  ;;  %v320_v23 = vmul.f32 %v884_v16, %v1225_v17  ;;  %v321_v26 = vmul.f32 %v885_v21, %v1225_v17 }
  0x11   :  { %v175_v22 = vadd.f32 %v147_v11, %v89_v14  ;;  %v176_v25 = vadd.f32 %v148_v13, %v90_v18  ;;  %v406_v27 = vmul.f32 %v913_v24, %v1228_v19  ;;  %v1240_v28 = vstv %s970_s26  ;;  %v973_v13 = vld [vmem:[%s1782_s0 + $0x48] sm:$0xff] }
  0x12   :  { %v1249_v33 = vstv %s999_s6  ;;  %v407_v35 = vmul.f32 %v914_v29, %v1228_v19  ;;  %v492_v40 = vmul.f32 %v942_v32, %v1240_v28  ;;  %v493_v43 = vmul.f32 %v943_v37, %v1240_v28 }
  0x13   :  { %v261_v31 = vadd.f32 %v233_v15, %v175_v22  ;;  %v262_v34 = vadd.f32 %v234_v20, %v176_v25  ;;  %v1252_v36 = vstv %s1028_s7  ;;  %v579_v44 = vmul.f32 %v971_v41, %v1249_v33  ;;  %v1002_v22 = vld [vmem:[%s1782_s0 + $0x49] sm:$0xff] }
  0x14   :  { %v1268_v46 = vstv %s1217_s2  ;;  %v91_v48 = vadd.f32 %v1202_v5, %v61_v30  ;;  %v235_v49 = vmul.f32 %v942_v32, %v1215_v12  ;;  %v665_v51 = vmul.f32 %v1000_v45, %v1252_v36  ;;  %v1031_v32 = vld [vmem:[%s1782_s0 + $0x4a] sm:$0xff] }
  0x15   :  { %v348_v39 = vadd.f32 %v320_v23, %v261_v31  ;;  %v349_v42 = vadd.f32 %v321_v26, %v262_v34  ;;  %v580_v53 = vmul.f32 %v972_v47, %v1249_v33  ;;  %v666_v56 = vmul.f32 %v1001_v54, %v1252_v36 }
  0x16   :  { %v177_v57 = vadd.f32 %v149_v38, %v91_v48  ;;  %v322_v58 = vmul.f32 %v971_v41, %v1225_v17  ;;  %v62_v59 = vmul.f32 %v885_v21, %v1197_v4  ;;  %v751_v61 = vmul.f32 %v1029_v55, %v1268_v46 }
  0x17   :  { %v434_v50 = vadd.f32 %v406_v27, %v348_v39  ;;  %v435_v52 = vadd.f32 %v407_v35, %v349_v42  ;;  %v150_v63 = vmul.f32 %v914_v29, %v1208_v8  ;;  %v408_v2 = vmul.f32 %v1000_v45, %v1228_v19 }
  0x18   :  { %v263_v1 = vadd.f32 %v235_v49, %v177_v57  ;;  %v92_v3 = vadd.f32 %v1202_v5, %v62_v59  ;;  %v236_v6 = vmul.f32 %v943_v37, %v1215_v12  ;;  %v752_v10 = vmul.f32 %v1030_v0, %v1268_v46  ;;  %v1003_v49 = vld [vmem:[%s1782_s0 + $0x51] sm:$0xff]  ;;  %v975_v59 = vld [vmem:[%s1782_s0 + $0x60] sm:$0xff] }
  0x19   :  { %v520_v60 = vadd.f32 %v492_v40, %v434_v50  ;;  %v521_v62 = vadd.f32 %v493_v43, %v435_v52  ;;  %v494_v11 = vmul.f32 %v1029_v55, %v1240_v28  ;;  %v581_v15 = vmul.f32 %v973_v13, %v1249_v33 }
  0x1a   :  { %v350_v14 = vadd.f32 %v322_v58, %v263_v1  ;;  %v178_v16 = vadd.f32 %v150_v63, %v92_v3  ;;  %v323_v18 = vmul.f32 %v972_v47, %v1225_v17  ;;  %v63_v23 = vmul.f32 %v971_v41, %v1197_v4  ;;  %v974_v41 = vld [vmem:[%s1782_s0 + $0x50] sm:$0xff]  ;;  %v1004_v3 = vld [vmem:[%s1782_s0 + $0x61] sm:$0xff] }
  0x1b   :  { %v607_v7 = vadd.f32 %v579_v44, %v520_v60  ;;  %v608_v9 = vadd.f32 %v580_v53, %v521_v62  ;;  %v151_v24 = vmul.f32 %v1000_v45, %v1208_v8  ;;  %v667_v26 = vmul.f32 %v1002_v22, %v1252_v36  ;;  %v1032_v58 = vld [vmem:[%s1782_s0 + $0x52] sm:$0xff] }
  0x1c   :  { %v436_v25 = vadd.f32 %v408_v2, %v350_v14  ;;  %v264_v27 = vadd.f32 %v236_v6, %v178_v16  ;;  %v409_v29 = vmul.f32 %v1001_v54, %v1228_v19  ;;  %v93_v34 = vadd.f32 %v1202_v5, %v63_v23 }
  0x1d   :  { %v693_v20 = vadd.f32 %v665_v51, %v607_v7  ;;  %v694_v21 = vadd.f32 %v666_v56, %v608_v9  ;;  %v237_v35 = vmul.f32 %v1029_v55, %v1215_v12  ;;  %v753_v38 = vmul.f32 %v1031_v32, %v1268_v46 }
  0x1e   :  { %v522_v37 = vadd.f32 %v494_v11, %v436_v25  ;;  %v351_v39 = vadd.f32 %v323_v18, %v264_v27  ;;  %v495_v40 = vmul.f32 %v1030_v0, %v1240_v28  ;;  %v582_v42 = vmul.f32 %v974_v41, %v1249_v33  ;;  %v1033_v18 = vld [vmem:[%s1782_s0 + $0x62] sm:$0xff] }
  0x1f   :  { %v779_v30 = vadd.f32 %v751_v61, %v693_v20  ;;  %v780_v31 = vadd.f32 %v752_v10, %v694_v21  ;;  %v179_v43 = vadd.f32 %v151_v24, %v93_v34  ;;  %v324_v44 = vmul.f32 %v973_v13, %v1225_v17 }
  0x20   :  { %v609_v45 = vadd.f32 %v581_v15, %v522_v37  ;;  %v437_v48 = vadd.f32 %v409_v29, %v351_v39  ;;  %v64_v50 = vmul.f32 %v972_v47, %v1197_v4  ;;  %v668_v51 = vmul.f32 %v1003_v49, %v1252_v36 }
  0x21   :  { %1062 = vtanh.f32 %v779_v30  ;;  %v265_v52 = vadd.f32 %v237_v35, %v179_v43  ;;  %v410_v53 = vmul.f32 %v1002_v22, %v1228_v19  ;;  %v152_v55 = vmul.f32 %v1001_v54, %v1208_v8  ;;  %v1034_v43 = vld [vmem:[%s1782_s0 + $0x6a] sm:$0xff] }
  0x22   :  { %1064 = vtanh.f32 %v780_v31  ;;  %v695_v56 = vadd.f32 %v667_v26, %v609_v45  ;;  %v523_v57 = vadd.f32 %v495_v40, %v437_v48  ;;  %v94_v60 = vadd.f32 %v1202_v5, %v64_v50 }
  0x23   :  { %v238_v47 = vmul.f32 %v1030_v0, %v1215_v12  ;;  %v754_v61 = vmul.f32 %v1032_v58, %v1268_v46  ;;  %v352_v62 = vadd.f32 %v324_v44, %v265_v52  ;;  %v496_v63 = vmul.f32 %v1031_v32, %v1240_v28 }
  0x24   :  { %v583_v54 = vmul.f32 %v975_v59, %v1249_v33  ;;  %v781_v1 = vadd.f32 %v753_v38, %v695_v56  ;;  %v610_v2 = vadd.f32 %v582_v42, %v523_v57  ;;  %v180_v6 = vadd.f32 %v152_v55, %v94_v60  ;;  %v977_v56 = vld [vmem:[%s1782_s0 + $0x78] sm:$0xff] }
  0x25   :  { %v325_v7 = vmul.f32 %v974_v41, %v1225_v17  ;;  %v438_v10 = vadd.f32 %v410_v53, %v352_v62  ;;  %v669_v0 = vmul.f32 %v1004_v3, %v1252_v36  ;;  %v65_v11 = vmul.f32 %v973_v13, %v1197_v4  ;;  %v976_v13 = vld [vmem:[%s1782_s0 + $0x68] sm:$0xff] }
  0x26   :  { %v153_v14 = vmul.f32 %v1002_v22, %v1208_v8  ;;  %1066 = vtanh.f32 %v781_v1  ;;  %v696_v16 = vadd.f32 %v668_v51, %v610_v2  ;;  %v266_v20 = vadd.f32 %v238_v47, %v180_v6 }
  0x27   :  { %v1063_v9 = vpop.eup %1062  ;;  %v411_v21 = vmul.f32 %v1003_v49, %v1228_v19  ;;  %v524_v23 = vadd.f32 %v496_v63, %v438_v10  ;;  %v755_v24 = vmul.f32 %v1033_v18, %v1268_v46  ;;  %v95_v22 = vadd.f32 %v1202_v5, %v65_v11  ;;  %v1035_v10 = vld [vmem:[%s1782_s0 + $0x7a] sm:$0xff] }
  0x28   :  { %v1065_v15 = vpop.eup %1064  ;;  %835 = vst [vmem:[#allocation6] sm:$0xff] %v1063_v9  ;;  %v239_v25 = vmul.f32 %v1031_v32, %v1215_v12  ;;  %v782_v26 = vadd.f32 %v754_v61, %v696_v16  ;;  %v353_v27 = vadd.f32 %v325_v7, %v266_v20  ;;  %v497_v29 = vmul.f32 %v1032_v58, %v1240_v28  ;;  %v1005_v32 = vld [vmem:[%s1782_s0 + $0x69] sm:$0xff]  ;;  %v978_v16 = vld [vmem:[%s1782_s0 + $0x80] sm:$0xff] }
  0x29   :  { %836 = vst [vmem:[#allocation6 + $0x8] sm:$0xff] %v1065_v15  ;;  %v584_v30 = vmul.f32 %v976_v13, %v1249_v33  ;;  %v611_v31 = vadd.f32 %v583_v54, %v524_v23  ;;  %v181_v34 = vadd.f32 %v153_v14, %v95_v22  ;;  %v326_v35 = vmul.f32 %v975_v59, %v1225_v17  ;;  %v1006_v54 = vld [vmem:[%s1782_s0 + $0x79] sm:$0xff] }
  0x2a   :  { %v66_v37 = vmul.f32 %v974_v41, %v1197_v4  ;;  %1068 = vtanh.f32 %v782_v26  ;;  %v439_v38 = vadd.f32 %v411_v21, %v353_v27  ;;  %v412_v39 = vmul.f32 %v1004_v3, %v1228_v19 }
  0x2b   :  { %v154_v40 = vmul.f32 %v1003_v49, %v1208_v8  ;;  %v697_v42 = vadd.f32 %v669_v0, %v611_v31  ;;  %v267_v44 = vadd.f32 %v239_v25, %v181_v34  ;;  %v240_v41 = vmul.f32 %v1032_v58, %v1215_v12 }
  0x2c   :  { %v96_v45 = vadd.f32 %v1202_v5, %v66_v37  ;;  %v1067_v48 = vpop.eup %1066  ;;  %v525_v50 = vadd.f32 %v497_v29, %v439_v38  ;;  %v670_v51 = vmul.f32 %v1005_v32, %v1252_v36  ;;  %v756_v49 = vmul.f32 %v1034_v43, %v1268_v46  ;;  %v1036_v38 = vld [vmem:[%s1782_s0 + $0x82] sm:$0xff] }
  0x2d   :  { %v498_v52 = vmul.f32 %v1033_v18, %v1240_v28  ;;  %837 = vst [vmem:[#allocation6 + $0x10] sm:$0xff] %v1067_v48  ;;  %v783_v53 = vadd.f32 %v755_v24, %v697_v42  ;;  %v354_v55 = vadd.f32 %v326_v35, %v267_v44  ;;  %v327_v60 = vmul.f32 %v976_v13, %v1225_v17 }
  0x2e   :  { %v182_v57 = vadd.f32 %v154_v40, %v96_v45  ;;  %v612_v47 = vadd.f32 %v584_v30, %v525_v50  ;;  %v585_v58 = vmul.f32 %v977_v56, %v1249_v33  ;;  %v67_v61 = vmul.f32 %v975_v59, %v1197_v4  ;;  %v1008_v50 = vld [vmem:[%s1782_s0 + $0x91] sm:$0xff] }
  0x2f   :  { %v155_v62 = vmul.f32 %v1004_v3, %v1208_v8  ;;  %1070 = vtanh.f32 %v783_v53  ;;  %v440_v63 = vadd.f32 %v412_v39, %v354_v55  ;;  %v413_v2 = vmul.f32 %v1005_v32, %v1228_v19  ;;  %v979_v39 = vld [vmem:[%s1782_s0 + $0x90] sm:$0xff] }
  0x30   :  { %v268_v1 = vadd.f32 %v240_v41, %v182_v57  ;;  %v1069_v6 = vpop.eup %1068  ;;  %v698_v7 = vadd.f32 %v670_v51, %v612_v47  ;;  %v671_v9 = vmul.f32 %v1006_v54, %v1252_v36  ;;  %v97_v59 = vadd.f32 %v1202_v5, %v67_v61 }
  0x31   :  { %v241_v3 = vmul.f32 %v1033_v18, %v1215_v12  ;;  %838 = vst [vmem:[#allocation6 + $0x18] sm:$0xff] %v1069_v6  ;;  %v526_v0 = vadd.f32 %v498_v52, %v440_v63  ;;  %v757_v11 = vmul.f32 %v1035_v10, %v1268_v46  ;;  %v499_v15 = vmul.f32 %v1034_v43, %v1240_v28  ;;  %v1007_v18 = vld [vmem:[%s1782_s0 + $0x81] sm:$0xff] }
  0x32   :  { %v355_v14 = vadd.f32 %v327_v60, %v268_v1  ;;  %v784_v20 = vadd.f32 %v756_v49, %v698_v7  ;;  %v586_v21 = vmul.f32 %v978_v16, %v1249_v33  ;;  %v183_v23 = vadd.f32 %v155_v62, %v97_v59  ;;  %v1037_v60 = vld [vmem:[%s1782_s0 + $0x92] sm:$0xff] }
  0x33   :  { %v328_v24 = vmul.f32 %v977_v56, %v1225_v17  ;;  %v613_v22 = vadd.f32 %v585_v58, %v526_v0  ;;  %v68_v26 = vmul.f32 %v976_v13, %v1197_v4  ;;  %v156_v27 = vmul.f32 %v1005_v32, %v1208_v8  ;;  %v980_v1 = vld [vmem:[%s1782_s0 + $0x98] sm:$0xff] }
  0x34   :  { %v441_v25 = vadd.f32 %v413_v2, %v355_v14  ;;  %1072 = vtanh.f32 %v784_v20  ;;  %v672_v29 = vmul.f32 %v1007_v18, %v1252_v36  ;;  %v269_v30 = vadd.f32 %v241_v3, %v183_v23  ;;  %v1038_v23 = vld [vmem:[%s1782_s0 + $0x9a] sm:$0xff] }
  0x35   :  { %v414_v31 = vmul.f32 %v1006_v54, %v1228_v19  ;;  %v1071_v34 = vpop.eup %1070  ;;  %v699_v35 = vadd.f32 %v671_v9, %v613_v22  ;;  %v98_v13 = vadd.f32 %v1202_v5, %v68_v26  ;;  %v242_v40 = vmul.f32 %v1034_v43, %v1215_v12 }
  0x36   :  { %v527_v37 = vadd.f32 %v499_v15, %v441_v25  ;;  %839 = vst [vmem:[#allocation6 + $0x20] sm:$0xff] %v1071_v34  ;;  %v758_v42 = vmul.f32 %v1036_v38, %v1268_v46  ;;  %v356_v32 = vadd.f32 %v328_v24, %v269_v30  ;;  %v500_v44 = vmul.f32 %v1035_v10, %v1240_v28  ;;  %v981_v34 = vld [vmem:[%s1782_s0 + $0xa8] sm:$0xff] }
  0x37   :  { %v587_v45 = vmul.f32 %v979_v39, %v1249_v33  ;;  %v785_v41 = vadd.f32 %v757_v11, %v699_v35  ;;  %v184_v51 = vadd.f32 %v156_v27, %v98_v13  ;;  %v329_v49 = vmul.f32 %v978_v16, %v1225_v17 }
  0x38   :  { %v614_v48 = vadd.f32 %v586_v21, %v527_v37  ;;  %v442_v52 = vadd.f32 %v414_v31, %v356_v32  ;;  %v673_v43 = vmul.f32 %v1008_v50, %v1252_v36  ;;  %v69_v53 = vmul.f32 %v977_v56, %v1197_v4  ;;  %v1009_v21 = vld [vmem:[%s1782_s0 + $0x99] sm:$0xff] }
  0x39   :  { %v157_v55 = vmul.f32 %v1006_v54, %v1208_v8  ;;  %1074 = vtanh.f32 %v785_v41  ;;  %v270_v47 = vadd.f32 %v242_v40, %v184_v51  ;;  %v415_v58 = vmul.f32 %v1007_v18, %v1228_v19 }
  0x3a   :  { %v700_v57 = vadd.f32 %v672_v29, %v614_v48  ;;  %v1073_v61 = vpop.eup %1072  ;;  %v528_v62 = vadd.f32 %v500_v44, %v442_v52  ;;  %v759_v63 = vmul.f32 %v1037_v60, %v1268_v46  ;;  %v99_v56 = vadd.f32 %v1202_v5, %v69_v53  ;;  %v1010_v44 = vld [vmem:[%s1782_s0 + $0xa9] sm:$0xff] }
  0x3b   :  { %v243_v54 = vmul.f32 %v1035_v10, %v1215_v12  ;;  %840 = vst [vmem:[#allocation6 + $0x28] sm:$0xff] %v1073_v61  ;;  %v357_v6 = vadd.f32 %v329_v49, %v270_v47  ;;  %v501_v7 = vmul.f32 %v1036_v38, %v1240_v28  ;;  %v588_v9 = vmul.f32 %v980_v1, %v1249_v33  ;;  %v1039_v52 = vld [vmem:[%s1782_s0 + $0xaa] sm:$0xff] }
  0x3c   :  { %v786_v2 = vadd.f32 %v758_v42, %v700_v57  ;;  %v615_v59 = vadd.f32 %v587_v45, %v528_v62  ;;  %v185_v3 = vadd.f32 %v157_v55, %v99_v56  ;;  %v330_v0 = vmul.f32 %v979_v39, %v1225_v17  ;;  %v982_v47 = vld [vmem:[%s1782_s0 + $0xb0] sm:$0xff] }
  0x3d   :  { %v70_v11 = vmul.f32 %v978_v16, %v1197_v4  ;;  %v443_v14 = vadd.f32 %v415_v58, %v357_v6  ;;  %v416_v15 = vmul.f32 %v1008_v50, %v1228_v19  ;;  %v158_v20 = vmul.f32 %v1007_v18, %v1208_v8 }
  0x3e   :  { %1076 = vtanh.f32 %v786_v2  ;;  %v701_v10 = vadd.f32 %v673_v43, %v615_v59  ;;  %v271_v24 = vadd.f32 %v243_v54, %v185_v3  ;;  %v244_v16 = vmul.f32 %v1036_v38, %v1215_v12 }
  0x3f   :  { %v100_v22 = vadd.f32 %v1202_v5, %v70_v11  ;;  %v1075_v25 = vpop.eup %1074  ;;  %v529_v26 = vadd.f32 %v501_v7, %v443_v14  ;;  %v674_v27 = vmul.f32 %v1009_v21, %v1252_v36  ;;  %v760_v18 = vmul.f32 %v1038_v23, %v1268_v46  ;;  %v1040_v14 = vld [vmem:[%s1782_s0 + $0xb2] sm:$0xff] }
  0x40   :  { %v502_v29 = vmul.f32 %v1037_v60, %v1240_v28  ;;  %841 = vst [vmem:[#allocation6 + $0x30] sm:$0xff] %v1075_v25  ;;  %v787_v30 = vadd.f32 %v759_v63, %v701_v10  ;;  %v358_v31 = vadd.f32 %v330_v0, %v271_v24  ;;  %v331_v37 = vmul.f32 %v980_v1, %v1225_v17 }
  0x41   :  { %v186_v35 = vadd.f32 %v158_v20, %v100_v22  ;;  %v616_v13 = vadd.f32 %v588_v9, %v529_v26  ;;  %v589_v38 = vmul.f32 %v981_v34, %v1249_v33  ;;  %v71_v40 = vmul.f32 %v979_v39, %v1197_v4  ;;  %v1012_v26 = vld [vmem:[%s1782_s0 + $0xc1] sm:$0xff] }
  0x42   :  { %v159_v42 = vmul.f32 %v1008_v50, %v1208_v8  ;;  %1078 = vtanh.f32 %v787_v30  ;;  %v444_v32 = vadd.f32 %v416_v15, %v358_v31  ;;  %v417_v41 = vmul.f32 %v1009_v21, %v1228_v19  ;;  %v983_v15 = vld [vmem:[%s1782_s0 + $0xc0] sm:$0xff] }
  0x43   :  { %v272_v45 = vadd.f32 %v244_v16, %v186_v35  ;;  %v702_v51 = vadd.f32 %v674_v27, %v616_v13  ;;  %v675_v49 = vmul.f32 %v1010_v44, %v1252_v36  ;;  %v101_v39 = vadd.f32 %v1202_v5, %v71_v40 }
  0x44   :  { %v1077_v48 = vpop.eup %1076  ;;  %v245_v50 = vmul.f32 %v1037_v60, %v1215_v12  ;;  %v530_v43 = vadd.f32 %v502_v29, %v444_v32  ;;  %v761_v53 = vmul.f32 %v1039_v52, %v1268_v46  ;;  %v503_v57 = vmul.f32 %v1038_v23, %v1240_v28  ;;  %v1011_v60 = vld [vmem:[%s1782_s0 + $0xb1] sm:$0xff] }
  0x45   :  { %842 = vst [vmem:[#allocation6 + $0x38] sm:$0xff] %v1077_v48  ;;  %v359_v55 = vadd.f32 %v331_v37, %v272_v45  ;;  %v788_v58 = vadd.f32 %v760_v18, %v702_v51  ;;  %v590_v61 = vmul.f32 %v982_v47, %v1249_v33  ;;  %v187_v62 = vadd.f32 %v159_v42, %v101_v39  ;;  %v1041_v37 = vld [vmem:[%s1782_s0 + $0xc2] sm:$0xff] }
  0x46   :  { %v332_v63 = vmul.f32 %v981_v34, %v1225_v17  ;;  %v617_v56 = vadd.f32 %v589_v38, %v530_v43  ;;  %v72_v2 = vmul.f32 %v980_v1, %v1197_v4  ;;  %v160_v6 = vmul.f32 %v1009_v21, %v1208_v8  ;;  %v984_v45 = vld [vmem:[%s1782_s0 + $0xc8] sm:$0xff] }
  0x47   :  { %v445_v54 = vadd.f32 %v417_v41, %v359_v55  ;;  %1080 = vtanh.f32 %v788_v58  ;;  %v676_v7 = vmul.f32 %v1011_v60, %v1252_v36  ;;  %v273_v9 = vadd.f32 %v245_v50, %v187_v62  ;;  %v1042_v62 = vld [vmem:[%s1782_s0 + $0xca] sm:$0xff] }
  0x48   :  { %v418_v59 = vmul.f32 %v1010_v44, %v1228_v19  ;;  %v1079_v3 = vpop.eup %1078  ;;  %v703_v0 = vadd.f32 %v675_v49, %v617_v56  ;;  %v102_v1 = vadd.f32 %v1202_v5, %v72_v2  ;;  %v246_v20 = vmul.f32 %v1038_v23, %v1215_v12 }
  0x49   :  { %v531_v11 = vadd.f32 %v503_v57, %v445_v54  ;;  %843 = vst [vmem:[#allocation6 + $0x40] sm:$0xff] %v1079_v3  ;;  %v762_v10 = vmul.f32 %v1040_v14, %v1268_v46  ;;  %v360_v21 = vadd.f32 %v332_v63, %v273_v9  ;;  %v504_v24 = vmul.f32 %v1039_v52, %v1240_v28  ;;  %v985_v3 = vld [vmem:[%s1782_s0 + $0xd8] sm:$0xff] }
  0x4a   :  { %v591_v22 = vmul.f32 %v983_v15, %v1249_v33  ;;  %v789_v16 = vadd.f32 %v761_v53, %v703_v0  ;;  %v188_v27 = vadd.f32 %v160_v6, %v102_v1  ;;  %v333_v18 = vmul.f32 %v982_v47, %v1225_v17 }
  0x4b   :  { %v618_v25 = vadd.f32 %v590_v61, %v531_v11  ;;  %v446_v29 = vadd.f32 %v418_v59, %v360_v21  ;;  %v677_v23 = vmul.f32 %v1012_v26, %v1252_v36  ;;  %v73_v30 = vmul.f32 %v981_v34, %v1197_v4  ;;  %v1013_v61 = vld [vmem:[%s1782_s0 + $0xc9] sm:$0xff] }
  0x4c   :  { %v161_v31 = vmul.f32 %v1010_v44, %v1208_v8  ;;  %1082 = vtanh.f32 %v789_v16  ;;  %v274_v13 = vadd.f32 %v246_v20, %v188_v27  ;;  %v419_v38 = vmul.f32 %v1011_v60, %v1228_v19 }
  0x4d   :  { %v704_v35 = vadd.f32 %v676_v7, %v618_v25  ;;  %v1081_v40 = vpop.eup %1080  ;;  %v532_v42 = vadd.f32 %v504_v24, %v446_v29  ;;  %v763_v32 = vmul.f32 %v1041_v37, %v1268_v46  ;;  %v103_v34 = vadd.f32 %v1202_v5, %v73_v30  ;;  %v1014_v24 = vld [vmem:[%s1782_s0 + $0xd9] sm:$0xff] }
  0x4e   :  { %v247_v44 = vmul.f32 %v1039_v52, %v1215_v12  ;;  %844 = vst [vmem:[#allocation6 + $0x48] sm:$0xff] %v1081_v40  ;;  %v361_v48 = vadd.f32 %v333_v18, %v274_v13  ;;  %v505_v51 = vmul.f32 %v1040_v14, %v1240_v28  ;;  %v592_v49 = vmul.f32 %v984_v45, %v1249_v33  ;;  %v1043_v29 = vld [vmem:[%s1782_s0 + $0xda] sm:$0xff] }
  0x4f   :  { %v790_v41 = vadd.f32 %v762_v10, %v704_v35  ;;  %v619_v39 = vadd.f32 %v591_v22, %v532_v42  ;;  %v189_v50 = vadd.f32 %v161_v31, %v103_v34  ;;  %v334_v43 = vmul.f32 %v983_v15, %v1225_v17  ;;  %v986_v13 = vld [vmem:[%s1782_s0 + $0xe0] sm:$0xff] }
  0x50   :  { %v74_v53 = vmul.f32 %v982_v47, %v1197_v4  ;;  %v447_v55 = vadd.f32 %v419_v38, %v361_v48  ;;  %v420_v57 = vmul.f32 %v1012_v26, %v1228_v19  ;;  %v162_v58 = vmul.f32 %v1011_v60, %v1208_v8 }
  0x51   :  { %1084 = vtanh.f32 %v790_v41  ;;  %v705_v52 = vadd.f32 %v677_v23, %v619_v39  ;;  %v275_v63 = vadd.f32 %v247_v44, %v189_v50  ;;  %v248_v47 = vmul.f32 %v1040_v14, %v1215_v12 }
  0x52   :  { %v104_v56 = vadd.f32 %v1202_v5, %v74_v53  ;;  %v1083_v54 = vpop.eup %1082  ;;  %v533_v2 = vadd.f32 %v505_v51, %v447_v55  ;;  %v678_v6 = vmul.f32 %v1013_v61, %v1252_v36  ;;  %v764_v60 = vmul.f32 %v1042_v62, %v1268_v46  ;;  %v1044_v55 = vld [vmem:[%s1782_s0 + $0xe2] sm:$0xff] }
  0x53   :  { %v506_v7 = vmul.f32 %v1041_v37, %v1240_v28  ;;  %845 = vst [vmem:[#allocation6 + $0x50] sm:$0xff] %v1083_v54  ;;  %v791_v9 = vadd.f32 %v763_v32, %v705_v52  ;;  %v362_v59 = vadd.f32 %v334_v43, %v275_v63  ;;  %v335_v11 = vmul.f32 %v984_v45, %v1225_v17 }
  0x54   :  { %v190_v0 = vadd.f32 %v162_v58, %v104_v56  ;;  %v620_v1 = vadd.f32 %v592_v49, %v533_v2  ;;  %v593_v14 = vmul.f32 %v985_v3, %v1249_v33  ;;  %v75_v20 = vmul.f32 %v983_v15, %v1197_v4  ;;  %v1016_v2 = vld [vmem:[%s1782_s0 + $0xf1] sm:$0xff] }
  0x55   :  { %v163_v10 = vmul.f32 %v1012_v26, %v1208_v8  ;;  %1086 = vtanh.f32 %v791_v9  ;;  %v448_v21 = vadd.f32 %v420_v57, %v362_v59  ;;  %v421_v16 = vmul.f32 %v1013_v61, %v1228_v19  ;;  %v987_v57 = vld [vmem:[%s1782_s0 + $0xf0] sm:$0xff] }
  0x56   :  { %v276_v22 = vadd.f32 %v248_v47, %v190_v0  ;;  %v706_v27 = vadd.f32 %v678_v6, %v620_v1  ;;  %v679_v18 = vmul.f32 %v1014_v24, %v1252_v36  ;;  %v105_v15 = vadd.f32 %v1202_v5, %v75_v20 }
  0x57   :  { %v1085_v25 = vpop.eup %1084  ;;  %v249_v26 = vmul.f32 %v1041_v37, %v1215_v12  ;;  %v534_v23 = vadd.f32 %v506_v7, %v448_v21  ;;  %v765_v30 = vmul.f32 %v1043_v29, %v1268_v46  ;;  %v507_v35 = vmul.f32 %v1042_v62, %v1240_v28  ;;  %v1015_v37 = vld [vmem:[%s1782_s0 + $0xe1] sm:$0xff] }
  0x58   :  { %846 = vst [vmem:[#allocation6 + $0x58] sm:$0xff] %v1085_v25  ;;  %v363_v31 = vadd.f32 %v335_v11, %v276_v22  ;;  %v792_v38 = vadd.f32 %v764_v60, %v706_v27  ;;  %v594_v40 = vmul.f32 %v986_v13, %v1249_v33  ;;  %v191_v42 = vadd.f32 %v163_v10, %v105_v15  ;;  %v1045_v11 = vld [vmem:[%s1782_s0 + $0xf2] sm:$0xff] }
  0x59   :  { %v336_v32 = vmul.f32 %v985_v3, %v1225_v17  ;;  %v621_v34 = vadd.f32 %v593_v14, %v534_v23  ;;  %v76_v41 = vmul.f32 %v984_v45, %v1197_v4  ;;  %v164_v48 = vmul.f32 %v1013_v61, %v1208_v8  ;;  %v988_v22 = vld [vmem:[%s1782_s0 + $0xf8] sm:$0xff] }
  0x5a   :  { %v449_v44 = vadd.f32 %v421_v16, %v363_v31  ;;  %1088 = vtanh.f32 %v792_v38  ;;  %v680_v51 = vmul.f32 %v1015_v37, %v1252_v36  ;;  %v277_v49 = vadd.f32 %v249_v26, %v191_v42  ;;  %v1046_v42 = vld [vmem:[%s1782_s0 + $0xfa] sm:$0xff] }
  0x5b   :  { %v422_v39 = vmul.f32 %v1014_v24, %v1228_v19  ;;  %v1087_v50 = vpop.eup %1086  ;;  %v707_v43 = vadd.f32 %v679_v18, %v621_v34  ;;  %v106_v45 = vadd.f32 %v1202_v5, %v76_v41  ;;  %v250_v58 = vmul.f32 %v1042_v62, %v1215_v12 }
  0x5c   :  { %v535_v53 = vadd.f32 %v507_v35, %v449_v44  ;;  %847 = vst [vmem:[#allocation6 + $0x60] sm:$0xff] %v1087_v50  ;;  %v766_v52 = vmul.f32 %v1044_v55, %v1268_v46  ;;  %v364_v61 = vadd.f32 %v336_v32, %v277_v49  ;;  %v508_v63 = vmul.f32 %v1043_v29, %v1240_v28  ;;  %v989_v50 = vld [vmem:[%s1782_s0 + $0x108] sm:$0xff] }
  0x5d   :  { %v595_v56 = vmul.f32 %v987_v57, %v1249_v33  ;;  %v793_v47 = vadd.f32 %v765_v30, %v707_v43  ;;  %v192_v6 = vadd.f32 %v164_v48, %v106_v45  ;;  %v337_v60 = vmul.f32 %v986_v13, %v1225_v17 }
  0x5e   :  { %v622_v54 = vadd.f32 %v594_v40, %v535_v53  ;;  %v450_v7 = vadd.f32 %v422_v39, %v364_v61  ;;  %v681_v62 = vmul.f32 %v1016_v2, %v1252_v36  ;;  %v77_v9 = vmul.f32 %v985_v3, %v1197_v4  ;;  %v1017_v40 = vld [vmem:[%s1782_s0 + $0xf9] sm:$0xff] }
  0x5f   :  { %v165_v59 = vmul.f32 %v1014_v24, %v1208_v8  ;;  %1090 = vtanh.f32 %v793_v47  ;;  %v278_v1 = vadd.f32 %v250_v58, %v192_v6  ;;  %v423_v14 = vmul.f32 %v1015_v37, %v1228_v19 }
  0x60   :  { %v708_v0 = vadd.f32 %v680_v51, %v622_v54  ;;  %v1089_v20 = vpop.eup %1088  ;;  %v536_v10 = vadd.f32 %v508_v63, %v450_v7  ;;  %v767_v21 = vmul.f32 %v1045_v11, %v1268_v46  ;;  %v107_v3 = vadd.f32 %v1202_v5, %v77_v9  ;;  %v1018_v63 = vld [vmem:[%s1782_s0 + $0x109] sm:$0xff] }
  0x61   :  { %v251_v24 = vmul.f32 %v1043_v29, %v1215_v12  ;;  %848 = vst [vmem:[#allocation6 + $0x68] sm:$0xff] %v1089_v20  ;;  %v365_v25 = vadd.f32 %v337_v60, %v278_v1  ;;  %v509_v27 = vmul.f32 %v1044_v55, %v1240_v28  ;;  %v596_v18 = vmul.f32 %v988_v22, %v1249_v33  ;;  %v1047_v7 = vld [vmem:[%s1782_s0 + $0x10a] sm:$0xff] }
  0x62   :  { %v794_v16 = vadd.f32 %v766_v52, %v708_v0  ;;  %v623_v15 = vadd.f32 %v595_v56, %v536_v10  ;;  %v193_v26 = vadd.f32 %v165_v59, %v107_v3  ;;  %v338_v23 = vmul.f32 %v987_v57, %v1225_v17  ;;  %v990_v1 = vld [vmem:[%s1782_s0 + $0x110] sm:$0xff] }
  0x63   :  { %v78_v30 = vmul.f32 %v986_v13, %v1197_v4  ;;  %v451_v31 = vadd.f32 %v423_v14, %v365_v25  ;;  %v424_v35 = vmul.f32 %v1016_v2, %v1228_v19  ;;  %v166_v38 = vmul.f32 %v1015_v37, %v1208_v8 }
  0x64   :  { %1092 = vtanh.f32 %v794_v16  ;;  %v709_v29 = vadd.f32 %v681_v62, %v623_v15  ;;  %v279_v32 = vadd.f32 %v251_v24, %v193_v26  ;;  %v252_v13 = vmul.f32 %v1044_v55, %v1215_v12 }
  0x65   :  { %v108_v34 = vadd.f32 %v1202_v5, %v78_v30  ;;  %v1091_v44 = vpop.eup %1090  ;;  %v537_v41 = vadd.f32 %v509_v27, %v451_v31  ;;  %v682_v48 = vmul.f32 %v1017_v40, %v1252_v36  ;;  %v768_v37 = vmul.f32 %v1046_v42, %v1268_v46  ;;  %v1048_v31 = vld [vmem:[%s1782_s0 + $0x112] sm:$0xff] }
  0x66   :  { %v510_v51 = vmul.f32 %v1045_v11, %v1240_v28  ;;  %849 = vst [vmem:[#allocation6 + $0x70] sm:$0xff] %v1091_v44  ;;  %v795_v49 = vadd.f32 %v767_v21, %v709_v29  ;;  %v366_v39 = vadd.f32 %v338_v23, %v279_v32  ;;  %v339_v53 = vmul.f32 %v988_v22, %v1225_v17 }
  0x67   :  { %v194_v43 = vadd.f32 %v166_v38, %v108_v34  ;;  %v624_v45 = vadd.f32 %v596_v18, %v537_v41  ;;  %v597_v55 = vmul.f32 %v989_v50, %v1249_v33  ;;  %v79_v58 = vmul.f32 %v987_v57, %v1197_v4  ;;  %v1020_v41 = vld [vmem:[%s1782_s0 + $0x121] sm:$0xff] }
  0x68   :  { %v167_v52 = vmul.f32 %v1016_v2, %v1208_v8  ;;  %1094 = vtanh.f32 %v795_v49  ;;  %v452_v61 = vadd.f32 %v424_v35, %v366_v39  ;;  %v425_v47 = vmul.f32 %v1017_v40, %v1228_v19  ;;  %v991_v35 = vld [vmem:[%s1782_s0 + $0x120] sm:$0xff] }
  0x69   :  { %v280_v56 = vadd.f32 %v252_v13, %v194_v43  ;;  %v710_v6 = vadd.f32 %v682_v48, %v624_v45  ;;  %v683_v60 = vmul.f32 %v1018_v63, %v1252_v36  ;;  %v109_v57 = vadd.f32 %v1202_v5, %v79_v58 }
  0x6a   :  { %v1093_v54 = vpop.eup %1092  ;;  %v253_v2 = vmul.f32 %v1045_v11, %v1215_v12  ;;  %v538_v62 = vadd.f32 %v510_v51, %v452_v61  ;;  %v769_v9 = vmul.f32 %v1047_v7, %v1268_v46  ;;  %v511_v0 = vmul.f32 %v1046_v42, %v1240_v28  ;;  %v1019_v11 = vld [vmem:[%s1782_s0 + $0x111] sm:$0xff] }
  0x6b   :  { %850 = vst [vmem:[#allocation6 + $0x78] sm:$0xff] %v1093_v54  ;;  %v367_v59 = vadd.f32 %v339_v53, %v280_v56  ;;  %v796_v14 = vadd.f32 %v768_v37, %v710_v6  ;;  %v598_v20 = vmul.f32 %v990_v1, %v1249_v33  ;;  %v195_v10 = vadd.f32 %v167_v52, %v109_v57  ;;  %v1049_v53 = vld [vmem:[%s1782_s0 + $0x122] sm:$0xff] }
  0x6c   :  { %v340_v21 = vmul.f32 %v989_v50, %v1225_v17  ;;  %v625_v3 = vadd.f32 %v597_v55, %v538_v62  ;;  %v80_v16 = vmul.f32 %v988_v22, %v1197_v4  ;;  %v168_v25 = vmul.f32 %v1017_v40, %v1208_v8  ;;  %v992_v56 = vld [vmem:[%s1782_s0 + $0x128] sm:$0xff] }
  0x6d   :  { %v453_v24 = vadd.f32 %v425_v47, %v367_v59  ;;  %1096 = vtanh.f32 %v796_v14  ;;  %v684_v27 = vmul.f32 %v1019_v11, %v1252_v36  ;;  %v281_v18 = vadd.f32 %v253_v2, %v195_v10  ;;  %v1050_v10 = vld [vmem:[%s1782_s0 + $0x12a] sm:$0xff] }
  0x6e   :  { %v426_v15 = vmul.f32 %v1018_v63, %v1228_v19  ;;  %v1095_v26 = vpop.eup %1094  ;;  %v711_v23 = vadd.f32 %v683_v60, %v625_v3  ;;  %v110_v22 = vadd.f32 %v1202_v5, %v80_v16  ;;  %v254_v38 = vmul.f32 %v1046_v42, %v1215_v12 }
  0x6f   :  { %v539_v30 = vadd.f32 %v511_v0, %v453_v24  ;;  %851 = vst [vmem:[#allocation6 + $0x80] sm:$0xff] %v1095_v26  ;;  %v770_v29 = vmul.f32 %v1048_v31, %v1268_v46  ;;  %v368_v40 = vadd.f32 %v340_v21, %v281_v18  ;;  %v512_v32 = vmul.f32 %v1047_v7, %v1240_v28  ;;  %v993_v26 = vld [vmem:[%s1782_s0 + $0x138] sm:$0xff] }
  0x70   :  { %v599_v34 = vmul.f32 %v991_v35, %v1249_v33  ;;  %v797_v13 = vadd.f32 %v769_v9, %v711_v23  ;;  %v196_v48 = vadd.f32 %v168_v25, %v110_v22  ;;  %v341_v37 = vmul.f32 %v990_v1, %v1225_v17 }
  0x71   :  { %v626_v44 = vadd.f32 %v598_v20, %v539_v30  ;;  %v454_v51 = vadd.f32 %v426_v15, %v368_v40  ;;  %v685_v42 = vmul.f32 %v1020_v41, %v1252_v36  ;;  %v81_v49 = vmul.f32 %v989_v50, %v1197_v4  ;;  %v1021_v20 = vld [vmem:[%s1782_s0 + $0x129] sm:$0xff] }
  0x72   :  { %v169_v39 = vmul.f32 %v1018_v63, %v1208_v8  ;;  %1098 = vtanh.f32 %v797_v13  ;;  %v282_v45 = vadd.f32 %v254_v38, %v196_v48  ;;  %v427_v55 = vmul.f32 %v1019_v11, %v1228_v19 }
  0x73   :  { %v712_v43 = vadd.f32 %v684_v27, %v626_v44  ;;  %v1097_v58 = vpop.eup %1096  ;;  %v540_v52 = vadd.f32 %v512_v32, %v454_v51  ;;  %v771_v61 = vmul.f32 %v1049_v53, %v1268_v46  ;;  %v111_v50 = vadd.f32 %v1202_v5, %v81_v49  ;;  %v1022_v32 = vld [vmem:[%s1782_s0 + $0x139] sm:$0xff] }
  0x74   :  { %v255_v63 = vmul.f32 %v1047_v7, %v1215_v12  ;;  %852 = vst [vmem:[#allocation6 + $0x88] sm:$0xff] %v1097_v58  ;;  %v369_v54 = vadd.f32 %v341_v37, %v282_v45  ;;  %v513_v6 = vmul.f32 %v1048_v31, %v1240_v28  ;;  %v600_v60 = vmul.f32 %v992_v56, %v1249_v33  ;;  %v1051_v51 = vld [vmem:[%s1782_s0 + $0x13a] sm:$0xff] }
  0x75   :  { %v798_v47 = vadd.f32 %v770_v29, %v712_v43  ;;  %v627_v57 = vadd.f32 %v599_v34, %v540_v52  ;;  %v197_v2 = vadd.f32 %v169_v39, %v111_v50  ;;  %v342_v62 = vmul.f32 %v991_v35, %v1225_v17  ;;  %v994_v45 = vld [vmem:[%s1782_s0 + $0x140] sm:$0xff] }
  0x76   :  { %v82_v9 = vmul.f32 %v990_v1, %v1197_v4  ;;  %v455_v59 = vadd.f32 %v427_v55, %v369_v54  ;;  %v428_v0 = vmul.f32 %v1020_v41, %v1228_v19  ;;  %v170_v14 = vmul.f32 %v1019_v11, %v1208_v8 }
  0x77   :  { %1100 = vtanh.f32 %v798_v47  ;;  %v713_v7 = vadd.f32 %v685_v42, %v627_v57  ;;  %v283_v21 = vadd.f32 %v255_v63, %v197_v2  ;;  %v256_v1 = vmul.f32 %v1048_v31, %v1215_v12 }
  0x78   :  { %v112_v3 = vadd.f32 %v1202_v5, %v82_v9  ;;  %v1099_v24 = vpop.eup %1098  ;;  %v541_v16 = vadd.f32 %v513_v6, %v455_v59  ;;  %v686_v25 = vmul.f32 %v1021_v20, %v1252_v36  ;;  %v772_v11 = vmul.f32 %v1050_v10, %v1268_v46  ;;  %v1052_v59 = vld [vmem:[%s1782_s0 + $0x142] sm:$0xff] }
  0x79   :  { %v514_v27 = vmul.f32 %v1049_v53, %v1240_v28  ;;  %853 = vst [vmem:[#allocation6 + $0x90] sm:$0xff] %v1099_v24  ;;  %v799_v18 = vadd.f32 %v771_v61, %v713_v7  ;;  %v370_v15 = vadd.f32 %v342_v62, %v283_v21  ;;  %v343_v30 = vmul.f32 %v992_v56, %v1225_v17 }
  0x7a   :  { %v198_v23 = vadd.f32 %v170_v14, %v112_v3  ;;  %v628_v22 = vadd.f32 %v600_v60, %v541_v16  ;;  %v601_v31 = vmul.f32 %v993_v26, %v1249_v33  ;;  %v83_v38 = vmul.f32 %v991_v35, %v1197_v4  ;;  %v1024_v16 = vld [vmem:[%s1782_s0 + $0x151] sm:$0xff] }
  0x7b   :  { %v171_v29 = vmul.f32 %v1020_v41, %v1208_v8  ;;  %1102 = vtanh.f32 %v799_v18  ;;  %v456_v40 = vadd.f32 %v428_v0, %v370_v15  ;;  %v429_v13 = vmul.f32 %v1021_v20, %v1228_v19  ;;  %v995_v0 = vld [vmem:[%s1782_s0 + $0x150] sm:$0xff] }
  0x7c   :  { %v284_v34 = vadd.f32 %v256_v1, %v198_v23  ;;  %v714_v48 = vadd.f32 %v686_v25, %v628_v22  ;;  %v687_v37 = vmul.f32 %v1022_v32, %v1252_v36  ;;  %v113_v35 = vadd.f32 %v1202_v5, %v83_v38 }
  0x7d   :  { %v1101_v44 = vpop.eup %1100  ;;  %v257_v41 = vmul.f32 %v1049_v53, %v1215_v12  ;;  %v542_v42 = vadd.f32 %v514_v27, %v456_v40  ;;  %v773_v49 = vmul.f32 %v1051_v51, %v1268_v46  ;;  %v515_v43 = vmul.f32 %v1050_v10, %v1240_v28  ;;  %v1023_v53 = vld [vmem:[%s1782_s0 + $0x141] sm:$0xff] }
  0x7e   :  { %854 = vst [vmem:[#allocation6 + $0x98] sm:$0xff] %v1101_v44  ;;  %v371_v39 = vadd.f32 %v343_v30, %v284_v34  ;;  %v800_v55 = vadd.f32 %v772_v11, %v714_v48  ;;  %v602_v58 = vmul.f32 %v994_v45, %v1249_v33  ;;  %v199_v52 = vadd.f32 %v171_v29, %v113_v35  ;;  %v1053_v30 = vld [vmem:[%s1782_s0 + $0x152] sm:$0xff] }
  0x7f   :  { %v344_v61 = vmul.f32 %v993_v26, %v1225_v17  ;;  %v629_v50 = vadd.f32 %v601_v31, %v542_v42  ;;  %v84_v47 = vmul.f32 %v992_v56, %v1197_v4  ;;  %v172_v54 = vmul.f32 %v1021_v20, %v1208_v8  ;;  %v996_v34 = vld [vmem:[%s1782_s0 + $0x158] sm:$0xff] }
  0x80   :  { %v457_v63 = vadd.f32 %v429_v13, %v371_v39  ;;  %1104 = vtanh.f32 %v800_v55  ;;  %v688_v6 = vmul.f32 %v1023_v53, %v1252_v36  ;;  %v285_v60 = vadd.f32 %v257_v41, %v199_v52 }
  0x81   :  { %v430_v57 = vmul.f32 %v1022_v32, %v1228_v19  ;;  %v1103_v2 = vpop.eup %1102  ;;  %v715_v62 = vadd.f32 %v687_v37, %v629_v50  ;;  %v114_v56 = vadd.f32 %v1202_v5, %v84_v47  ;;  %v258_v14 = vmul.f32 %v1050_v10, %v1215_v12 }
  0x82   :  { %v543_v9 = vadd.f32 %v515_v43, %v457_v63  ;;  %855 = vst [vmem:[#allocation6 + $0xa0] sm:$0xff] %v1103_v2  ;;  %v774_v7 = vmul.f32 %v1052_v59, %v1268_v46  ;;  %v372_v20 = vadd.f32 %v344_v61, %v285_v60  ;;  %v516_v21 = vmul.f32 %v1051_v51, %v1240_v28  ;;  %v997_v61 = vld [vmem:[%s1782_s0 + $0x168] sm:$0xff] }
  0x83   :  { %v603_v3 = vmul.f32 %v995_v0, %v1249_v33  ;;  %v801_v1 = vadd.f32 %v773_v49, %v715_v62  ;;  %v200_v25 = vadd.f32 %v172_v54, %v114_v56  ;;  %v345_v11 = vmul.f32 %v994_v45, %v1225_v17  ;;  %v1054_v54 = vld [vmem:[%s1782_s0 + $0x15a] sm:$0xff]  ;;  %v1026_v62 = vld [vmem:[%s1782_s0 + $0x169] sm:$0xff] }
  0x84   :  { %v630_v24 = vadd.f32 %v602_v58, %v543_v9  ;;  %v458_v27 = vadd.f32 %v430_v57, %v372_v20  ;;  %v689_v10 = vmul.f32 %v1024_v16, %v1252_v36  ;;  %v85_v18 = vmul.f32 %v993_v26, %v1197_v4  ;;  %v1025_v58 = vld [vmem:[%s1782_s0 + $0x159] sm:$0xff] }
  0x85   :  { %v173_v15 = vmul.f32 %v1022_v32, %v1208_v8  ;;  %1106 = vtanh.f32 %v801_v1  ;;  %v286_v22 = vadd.f32 %v258_v14, %v200_v25  ;;  %v431_v31 = vmul.f32 %v1023_v53, %v1228_v19 }
  0x86   :  { %v716_v23 = vadd.f32 %v688_v6, %v630_v24  ;;  %v1105_v38 = vpop.eup %1104  ;;  %v544_v29 = vadd.f32 %v516_v21, %v458_v27  ;;  %v775_v40 = vmul.f32 %v1053_v30, %v1268_v46  ;;  %v115_v26 = vadd.f32 %v1202_v5, %v85_v18 }
  0x87   :  { %v259_v32 = vmul.f32 %v1051_v51, %v1215_v12  ;;  %856 = vst [vmem:[#allocation6 + $0xa8] sm:$0xff] %v1105_v38  ;;  %v373_v44 = vadd.f32 %v345_v11, %v286_v22  ;;  %v517_v48 = vmul.f32 %v1052_v59, %v1240_v28  ;;  %v604_v37 = vmul.f32 %v996_v34, %v1249_v33 }
  0x88   :  { %v802_v13 = vadd.f32 %v774_v7, %v716_v23  ;;  %v631_v35 = vadd.f32 %v603_v3, %v544_v29  ;;  %v201_v41 = vadd.f32 %v173_v15, %v115_v26  ;;  %v346_v42 = vmul.f32 %v995_v0, %v1225_v17  ;;  %v998_v7 = vld [vmem:[%s1782_s0 + $0x170] sm:$0xff] }
  0x89   :  { %v86_v49 = vmul.f32 %v994_v45, %v1197_v4  ;;  %v459_v39 = vadd.f32 %v431_v31, %v373_v44  ;;  %v432_v43 = vmul.f32 %v1024_v16, %v1228_v19  ;;  %v174_v55 = vmul.f32 %v1023_v53, %v1208_v8 }
  0x8a   :  { %1108 = vtanh.f32 %v802_v13  ;;  %v717_v51 = vadd.f32 %v689_v10, %v631_v35  ;;  %v287_v52 = vadd.f32 %v259_v32, %v201_v41  ;;  %v260_v4 = vmul.f32 %v1052_v59, %v1215_v12  ;;  %v1056_v10 = vld [vmem:[%s1782_s0 + $0x172] sm:$0xff] }
  0x8b   :  { %v116_v50 = vadd.f32 %v1202_v5, %v86_v49  ;;  %v1107_v45 = vpop.eup %1106  ;;  %v545_v63 = vadd.f32 %v517_v48, %v459_v39  ;;  %v690_v47 = vmul.f32 %v1025_v58, %v1252_v36  ;;  %v518_v8 = vmul.f32 %v1053_v30, %v1240_v28 }
  0x8c   :  { %857 = vst [vmem:[#allocation6 + $0xb0] sm:$0xff] %v1107_v45  ;;  %v803_v53 = vadd.f32 %v775_v40, %v717_v51  ;;  %v374_v6 = vadd.f32 %v346_v42, %v287_v52  ;;  %v347_v57 = vmul.f32 %v996_v34, %v1225_v17  ;;  %v776_v5 = vmul.f32 %v1054_v54, %v1268_v46  ;;  %v1055_v17 = vld [vmem:[%s1782_s0 + $0x16a] sm:$0xff] }
  0x8d   :  { %v202_v60 = vadd.f32 %v174_v55, %v116_v50  ;;  %v632_v2 = vadd.f32 %v604_v37, %v545_v63  ;;  %v605_v12 = vmul.f32 %v997_v61, %v1249_v33  ;;  %v433_v0 = vmul.f32 %v1025_v58, %v1228_v19  ;;  %v1027_v19 = vld [vmem:[%s1782_s0 + $0x171] sm:$0xff] }
  0x8e   :  { %1110 = vtanh.f32 %v803_v53  ;;  %v460_v9 = vadd.f32 %v432_v43, %v374_v6  ;;  %v691_v21 = vmul.f32 %v1026_v62, %v1252_v36  ;;  %v519_v1 = vmul.f32 %v1054_v54, %v1240_v28 }
  0x8f   :  { %v288_v59 = vadd.f32 %v260_v4, %v202_v60  ;;  %v718_v14 = vadd.f32 %v690_v47, %v632_v2  ;;  %v777_v25 = vmul.f32 %v1055_v17, %v1268_v46  ;;  %v606_v27 = vmul.f32 %v998_v7, %v1249_v33 }
  0x90   :  { %v1109_v56 = vpop.eup %1108  ;;  %v546_v20 = vadd.f32 %v518_v8, %v460_v9  ;;  %v692_v28 = vmul.f32 %v1027_v19, %v1252_v36  ;;  %v778_v31 = vmul.f32 %v1056_v10, %v1268_v46 }
  0x91   :  { %858 = vst [vmem:[#allocation6 + $0xb8] sm:$0xff] %v1109_v56  ;;  %v375_v3 = vadd.f32 %v347_v57, %v288_v59  ;;  %v804_v24 = vadd.f32 %v776_v5, %v718_v14 }
  0x92   :  { %v633_v16 = vadd.f32 %v605_v12, %v546_v20 }
  0x93   :  { %v461_v11 = vadd.f32 %v433_v0, %v375_v3  ;;  %1112 = vtanh.f32 %v804_v24 }
  0x94   :  { %v1111_v18 = vpop.eup %1110  ;;  %v719_v15 = vadd.f32 %v691_v21, %v633_v16 }
  0x95   :  { %v547_v23 = vadd.f32 %v519_v1, %v461_v11  ;;  %859 = vst [vmem:[#allocation6 + $0xc0] sm:$0xff] %v1111_v18 }
  0x96   :  { %v805_v30 = vadd.f32 %v777_v25, %v719_v15 }
  0x97   :  { %v634_v22 = vadd.f32 %v606_v27, %v547_v23 }
  0x98   :  { %1114 = vtanh.f32 %v805_v30 }
  0x99   :  { %v720_v38 = vadd.f32 %v692_v28, %v634_v22  ;;  %v1113_v29 = vpop.eup %1112 }
  0x9a   :  { %860 = vst [vmem:[#allocation6 + $0xc8] sm:$0xff] %v1113_v29 }
  0x9b   :  { %v806_v33 = vadd.f32 %v778_v31, %v720_v38 }
  0x9d   :  { %1116 = vtanh.f32 %v806_v33 }
  0x9e   :  { %v1115_v40 = vpop.eup %1114 }
  0x9f   :  { %861 = vst [vmem:[#allocation6 + $0xd0] sm:$0xff] %v1115_v40 }
  0xa3   :  { %v1117_v36 = vpop.eup %1116 }
  0xa4   :  { %862 = vst [vmem:[#allocation6 + $0xd8] sm:$0xff] %v1117_v36 }
  0xa5   :  { %875 = dma.vmem_to_hbm [thread:$0]  %s868_s17, 3584, %s870_s19, [#allocation4], %s1160_s20, %s1160_s20, %s1161_s21  }
  0xa6   :  { %1156 = dma.done.wait [#allocation4], 3584  }
  0xa7   :  { %1157 = vsyncadd [#allocation4], 4294963712 }
  0xa8   :  { %880 = vsyncpa [#allocation4], 1 }
  0xa9   :  { %881 = vsyncpa [#allocation5], 1 }

</bundles_post_ra>
